<compile_context>
chip_gen: v5e
topology: v5e:2x2
jax: 0.10.0
libtpu: 0.0.40
codegen_flags: <defaults>
</compile_context>

<pallas_src>
import math

import numpy as np
import jax
import jax.numpy as jnp
from jax.experimental import pallas as pl
from jax.experimental.pallas import tpu as pltpu

# ----------------------------- configuration --------------------------------
DIM_INPUT = 3          # config.dimOutput (RGB input to the discriminator)
D0 = 16                # config.depthScale0
LEAK = 0.2             # config.leakyReluLeak
MINIBATCH_NORM = True  # config.miniBatchNormalization
H, W = 4, 4            # spatial (4x4 forced: Linear expects D0*16 inputs)
HW = H * W
SUBGROUP = 4           # miniBatchStdDev subGroupSize
OUT_LANES = 128        # lane-dense output slab width (feat lanes 0..D0-1,
                       # decision in lane D0)
USE_BF16_WEIGHTS = True

SCALE_RGB = math.sqrt(2.0 / (DIM_INPUT * 1 * 1))     # fan_in of 1x1 conv
SCALE_C3 = math.sqrt(2.0 / ((D0 + 1) * 3 * 3))       # fan_in of 3x3 conv (+std)
SCALE_L1 = math.sqrt(2.0 / (D0 * 16))                # fan_in of first linear
SCALE_DEC = math.sqrt(2.0 / D0)                      # fan_in of decision layer


# --------------------------- fused Pallas kernel -----------------------------
def dnet_kernel(x_ref, wrgb_ref, wc3_ref, wl1_ref, rows_ref, tail_ref, out_ref):
    """Entire DNet forward for ONE miniBatchStdDev subgroup (one grid step).

    x_ref    : (1, SG, C*H*W)   raw NCHW-flattened pixels of this subgroup
    wrgb_ref : (C*H*W, HW*D0)   1x1 conv; NCHW->NHWC fold baked into rows (bf16)
    wc3_ref  : (HW*D0, HW*D0)   3x3 pad-1 conv folded to one dense matmul (bf16)
    wl1_ref  : (HW*D0, 128)     Linear, NCHW-flatten fold + zero-padded lanes (bf16)
    rows_ref : (3, HW*D0)       f32 rows: [brgb ; srow (std-channel fold) ; bc3]
    tail_ref : (3, 128)         f32 rows: [bl1_pad ; wdec_pad ; out_bias_row]
    out_ref  : (1, SG, 128)     slab: feat in lanes [0,D0), decision in lane D0
    """
    sg = x_ref.shape[1]
    cdt = wrgb_ref.dtype                      # matmul operand dtype (bf16/f32)

    x = x_ref[0]                              # (SG, C*H*W) f32
    rows = rows_ref[...]
    brgb, srow, bc3 = rows[0:1, :], rows[1:2, :], rows[2:3, :]
    tail = tail_ref[...]
    bl1, wdec, outb = tail[0:1, :], tail[1:2, :], tail[2:3, :]

    # fromRGBLayers[-1]: 1x1 conv + LeakyReLU  ->  (SG, HW*D0), NHWC columns.
    y0 = jnp.dot(x.astype(cdt), wrgb_ref[...],
                 preferred_element_type=jnp.float32) + brgb
    y0 = jnp.where(y0 >= 0, y0, LEAK * y0)

    # miniBatchStdDev over this subgroup (grid tiles the batch in subGroupSize
    # chunks, so this matches PyTorch's grouping exactly for N % 4 == 0).
    if sg > 1:
        mean = jnp.mean(y0, axis=0, keepdims=True)
        var = jnp.sum((y0 - mean) ** 2, axis=0, keepdims=True) / (sg - 1)
        s = jnp.mean(jnp.sqrt(var + 1e-8), axis=1, keepdims=True)      # (1, 1)
        std_term = s * srow
    else:
        std_term = jnp.zeros_like(srow)       # PyTorch appends a zero channel

    # groupScaleZero[0]: 3x3 conv (pad=1) on [y0 | std channel] + LeakyReLU,
    # expressed as one dense MXU matmul + the std-channel rank-1 correction.
    y1 = (jnp.dot(y0.astype(cdt), wc3_ref[...],
                  preferred_element_type=jnp.float32) + std_term + bc3)
    y1 = jnp.where(y1 >= 0, y1, LEAK * y1)

    # groupScaleZero[1]: Linear(D0*16, D0) + LeakyReLU, emitted straight into a
    # 128-lane slab (lanes >= D0 have zero weight/bias -> stay exactly 0).
    feat = jnp.dot(y1.astype(cdt), wl1_ref[...],
                   preferred_element_type=jnp.float32) + bl1
    feat = jnp.where(feat >= 0, feat, LEAK * feat)                  # (SG, 128)

    # decisionLayer on the VPU/XLU (no 4th MXU matmul): lanes >= D0 of both
    # feat and wdec are zero, so the full-lane reduction equals the D0-dot.
    dec = jnp.sum(feat * wdec, axis=-1, keepdims=True)              # (SG, 1)

    # Single lane-dense output slab; the decision bias lives in lane D0 of
    # outb, so adding it finishes the decision layer with zero extra operands.
    lane = jax.lax.broadcasted_iota(jnp.int32, feat.shape, 1)
    out_ref[0] = (jnp.where(lane == D0, dec, feat) + outb).astype(out_ref.dtype)


# --------------------- one-time parameter preprocessing ----------------------
def _conv3x3_selection(h, w):
    """sel[ky, kx, p_in, p_out] = 1 iff input pixel p_in is the (ky, kx) tap of
    output pixel p_out for a 3x3 / stride-1 / pad-1 conv (zero padding)."""
    sel = np.zeros((3, 3, h * w, h * w), np.float32)
    for ky in range(3):
        for kx in range(3):
            for ho in range(h):
                for wo in range(w):
                    hi, wi = ho + ky - 1, wo + kx - 1
                    if 0 <= hi < h and 0 <= wi < w:
                        sel[ky, kx, hi * w + wi, ho * w + wo] = 1.0
    return sel


def prepare_params(params):
    """Weights-only preprocessing (done once; never touches activations).

    Folds the equalized-LR scales, the NCHW->NHWC input transpose, the 3x3
    conv's zero padding, the mbstd channel and the NCHW flatten into the fused
    kernel's operands, and packs the big matrices as bf16 MXU operands."""
    assert MINIBATCH_NORM, "kernel built for miniBatchNormalization=True"
    cin, d0 = params["rgb_w"].shape
    hw, hwd = HW, HW * D0

    # 1x1 conv consuming the RAW NCHW-flattened input:
    #   wrgb[c*HW + p, p*D0 + c_out] = rgb_w[c, c_out] * SCALE_RGB
    eye_hw = jnp.eye(hw, dtype=jnp.float32)
    wrgb = (jnp.einsum("pq,cd->cpqd", eye_hw, params["rgb_w"])
            .reshape(cin * hw, hwd) * SCALE_RGB)
    brgb = jnp.tile(params["rgb_b"].reshape(-1), hw).reshape(1, hwd) * SCALE_RGB

    # 3x3 conv (pad=1) as a dense (hwd, hwd) matmul; std channel -> row.
    sel = jnp.asarray(_conv3x3_selection(H, W))                    # (3,3,hw,hw)
    w3 = params["c3_w"]                                            # (3,3,d0+1,d0)
    wc3 = (jnp.einsum("yxio,yxcd->icod", sel, w3[:, :, :d0, :])
           .reshape(hwd, hwd) * SCALE_C3)
    srow = (jnp.einsum("yxio,yxd->od", sel, w3[:, :, d0, :])
            .reshape(1, hwd) * SCALE_C3)
    bc3 = jnp.tile(params["c3_b"].reshape(-1), hw).reshape(1, hwd) * SCALE_C3

    # Linear(D0*16, D0): rows permuted from the NCHW flatten index (c*hw + p)
    # to the kernel's NHWC index (p*d0 + c); columns zero-padded to 128 lanes.
    perm = (np.arange(d0)[None, :] * hw + np.arange(hw)[:, None]).reshape(-1)
    wl1 = params["l1_w"][jnp.asarray(perm)] * SCALE_L1             # (hwd, d0)
    wl1_pad = jnp.zeros((hwd, OUT_LANES), jnp.float32).at[:, :d0].set(wl1)
    bl1_pad = jnp.zeros((1, OUT_LANES), jnp.float32).at[:, :d0].set(
        params["l1_b"].reshape(1, d0) * SCALE_L1)

    # Decision layer: pre-transposed weight row + bias pre-scattered into
    # lane D0 of an additive output-bias row (no SMEM scalar, no extra DMA).
    wdec_pad = jnp.zeros((1, OUT_LANES), jnp.float32).at[:, :d0].set(
        params["dec_w"].reshape(1, d0) * SCALE_DEC)
    out_bias = jnp.zeros((1, OUT_LANES), jnp.float32).at[0, d0].set(
        params["dec_b"].reshape(()) * SCALE_DEC)

    rows = jnp.concatenate([brgb, srow, bc3], axis=0)              # (3, hwd)
    tail = jnp.concatenate([bl1_pad, wdec_pad, out_bias], axis=0)  # (3, 128)

    wdt = jnp.bfloat16 if USE_BF16_WEIGHTS else jnp.float32
    return (wrgb.astype(wdt), wc3.astype(wdt), wl1_pad.astype(wdt), rows, tail)


# ------------------------------ forward wrapper -------------------------------
@jax.jit
def _dnet_forward_core(x_nchw, prep):
    n, c, h, w = x_nchw.shape
    chw, hwd = c * h * w, h * w * D0

    # PyTorch miniBatchStdDev grouping rule (subGroupSize = 4).
    sg = min(n, SUBGROUP)
    if n % sg != 0:
        sg = n
    g = n // sg

    # Free, contiguous reshape (no transpose): groups x subgroup x NCHW-flat.
    x3 = x_nchw.reshape(g, sg, chw)

    flops = 2 * n * chw * hwd + 2 * n * hwd * hwd + 2 * n * hwd * OUT_LANES
    transcendentals = g * hwd                                      # sqrt per column
    bytes_accessed = int(x3.size * x3.dtype.itemsize
                         + sum(int(p.size) * p.dtype.itemsize for p in prep)
                         + n * OUT_LANES * 4)

    res3 = pl.pallas_call(
        dnet_kernel,
        out_shape=jax.ShapeDtypeStruct((g, sg, OUT_LANES), jnp.float32),
        grid=(g,),
        in_specs=[
            pl.BlockSpec((1, sg, chw), lambda i: (i, 0, 0)),        # x (per group)
            pl.BlockSpec((chw, hwd), lambda i: (0, 0)),             # wrgb (resident)
            pl.BlockSpec((hwd, hwd), lambda i: (0, 0)),             # wc3  (resident)
            pl.BlockSpec((hwd, OUT_LANES), lambda i: (0, 0)),       # wl1  (resident)
            pl.BlockSpec((3, hwd), lambda i: (0, 0)),               # bias/std rows
            pl.BlockSpec((3, OUT_LANES), lambda i: (0, 0)),         # bl1/wdec/outb
        ],
        out_specs=pl.BlockSpec((1, sg, OUT_LANES), lambda i: (i, 0, 0)),
        compiler_params=pltpu.CompilerParams(
            dimension_semantics=("parallel",)),
        cost_estimate=pl.CostEstimate(flops=int(flops),
                                      transcendentals=int(transcendentals),
                                      bytes_accessed=bytes_accessed),
    )(x3, *prep)

    res = res3.reshape(n, OUT_LANES)
    out = res[:, D0:D0 + 1]                                        # decision
    feat = res[:, :D0]                                             # features
    return out, feat


def dnet_forward(x_nchw, prep, get_feature=False):
    out, feat = _dnet_forward_core(x_nchw, prep)
    return (out, feat) if get_feature else out


# ------------------------------ pure-JAX reference ----------------------------
def ref_forward(x_nchw, params):
    """Faithful f32 re-implementation of the PyTorch module (scale 0)."""
    lrelu = lambda v: jnp.where(v >= 0, v, LEAK * v)
    n = x_nchw.shape[0]

    w0 = jnp.transpose(params["rgb_w"], (1, 0))[:, :, None, None]      # OIHW
    y = jax.lax.conv_general_dilated(x_nchw, w0, (1, 1), "VALID",
                                     dimension_numbers=("NCHW", "OIHW", "NCHW"))
    y = lrelu((y + params["rgb_b"].reshape(1, -1, 1, 1)) * SCALE_RGB)

    if MINIBATCH_NORM:                                 # miniBatchStdDev, sg=4
        sg = min(n, SUBGROUP)
        if n % sg != 0:
            sg = n
        g = n // sg
        if sg > 1:
            yg = y.reshape(g, sg, *y.shape[1:])
            var = jnp.var(yg, axis=1, ddof=1)                      # (g,C,H,W)
            s = jnp.mean(jnp.sqrt(var + 1e-8), axis=(1, 2, 3))     # (g,)
            std_map = jnp.broadcast_to(
                jnp.repeat(s, sg).reshape(n, 1, 1, 1),
                (n, 1, y.shape[2], y.shape[3]))
        else:
            std_map = jnp.zeros((n, 1, y.shape[2], y.shape[3]), y.dtype)
        y = jnp.concatenate([y, std_map], axis=1)

    w1 = jnp.transpose(params["c3_w"], (3, 2, 0, 1))                   # OIHW
    y = jax.lax.conv_general_dilated(y, w1, (1, 1), ((1, 1), (1, 1)),
                                     dimension_numbers=("NCHW", "OIHW", "NCHW"))
    y = lrelu((y + params["c3_b"].reshape(1, -1, 1, 1)) * SCALE_C3)

    y = y.reshape(n, -1)                                     # NCHW flatten
    feat = lrelu((y @ params["l1_w"] + params["l1_b"]) * SCALE_L1)
    out = (feat @ params["dec_w"] + params["dec_b"]) * SCALE_DEC
    return out, feat


# ----------------------------------- main -------------------------------------
if __name__ == "__main__":
    key = jax.random.PRNGKey(0)
    k1, k2, k3, k4, kx = jax.random.split(key, 5)

    params = {
        # EqualizedConv2d(dimInput, D0, 1): weight (Cin, Cout), bias
        "rgb_w": jax.random.normal(k1, (DIM_INPUT, D0), jnp.float32),
        "rgb_b": jnp.zeros((1, D0), jnp.float32),
        # EqualizedConv2d(D0+1, D0, 3, padding=1): weight (3, 3, Cin, Cout)
        "c3_w": jax.random.normal(k2, (3, 3, D0 + 1, D0), jnp.float32),
        "c3_b": jnp.zeros((1, D0), jnp.float32),
        # EqualizedLinear(D0*16, D0)
        "l1_w": jax.random.normal(k3, (D0 * 16, D0), jnp.float32),
        "l1_b": jnp.zeros((1, D0), jnp.float32),
        # decisionLayer: EqualizedLinear(D0, 1)
        "dec_w": jax.random.normal(k4, (D0, 1), jnp.float32),
        "dec_b": jnp.zeros((1, 1), jnp.float32),
    }

    # N = 16 -> 4 mbstd subgroups of 4 -> grid=(4,), exercises the parallel
    # batch grid while matching PyTorch's subGroupSize=4 grouping exactly.
    N = 16
    x = jax.random.normal(kx, (N, DIM_INPUT, H, W), jnp.float32)

    prep = prepare_params(params)                       # one-time weight prep
    out, feat = dnet_forward(x, prep, get_feature=True)
    out = jax.block_until_ready(out)
    feat = jax.block_until_ready(feat)

    ref_out, ref_feat = ref_forward(x, params)
    ref_out = jax.block_until_ready(ref_out)
    ref_feat = jax.block_until_ready(ref_feat)

    assert out.shape == (N, 1), out.shape
    assert feat.shape == (N, D0), feat.shape
    # bf16 MXU operands (perf review item 2) widen the tolerance vs. the pure
    # f32 reference; structural errors would be O(1), far above this.
    TOL = 5e-2 if USE_BF16_WEIGHTS else 2e-3
    assert jnp.allclose(out, ref_out, atol=TOL, rtol=TOL), (out, ref_out)
    assert jnp.allclose(feat, ref_feat, atol=TOL, rtol=TOL)

    print("KERNEL_OK")
</pallas_src>

<mosaic_0001>
module attributes {stable_mosaic.version = 11 : i64} {
  func.func @dnet_kernel(%arg0: i32, %arg1: memref<1x4x48xf32, #tpu.memory_space<vmem>>, %arg2: memref<48x256xbf16, #tpu.memory_space<vmem>>, %arg3: memref<256x256xbf16, #tpu.memory_space<vmem>>, %arg4: memref<256x128xbf16, #tpu.memory_space<vmem>>, %arg5: memref<3x256xf32, #tpu.memory_space<vmem>>, %arg6: memref<3x128xf32, #tpu.memory_space<vmem>>, %arg7: memref<1x4x128xf32, #tpu.memory_space<vmem>>) attributes {dimension_semantics = [#tpu.dimension_semantics<parallel>], iteration_bounds = array<i64: 4>, scalar_prefetch = 0 : i64, scratch_operands = 0 : i64, tpu.core_type = #tpu.core_type<tc>, window_params = [{transform_indices = @transform_0, window_bounds = array<i64: 1, 4, 48>}, {pipeline_mode = #tpu.pipeline_mode<synchronous>, transform_indices = @transform_1, window_bounds = array<i64: 48, 256>}, {pipeline_mode = #tpu.pipeline_mode<synchronous>, transform_indices = @transform_2, window_bounds = array<i64: 256, 256>}, {pipeline_mode = #tpu.pipeline_mode<synchronous>, transform_indices = @transform_3, window_bounds = array<i64: 256, 128>}, {pipeline_mode = #tpu.pipeline_mode<synchronous>, transform_indices = @transform_4, window_bounds = array<i64: 3, 256>}, {pipeline_mode = #tpu.pipeline_mode<synchronous>, transform_indices = @transform_5, window_bounds = array<i64: 3, 128>}, {transform_indices = @transform_6, window_bounds = array<i64: 1, 4, 128>}]} {
    %c0 = arith.constant 0 : index
    %c0_0 = arith.constant 0 : index
    %c0_1 = arith.constant 0 : index
    %0 = vector.load %arg1[%c0, %c0_0, %c0_1] : memref<1x4x48xf32, #tpu.memory_space<vmem>>, vector<1x4x48xf32>
    %1 = vector.shape_cast %0 : vector<1x4x48xf32> to vector<4x48xf32>
    %c0_2 = arith.constant 0 : index
    %c0_3 = arith.constant 0 : index
    %2 = vector.load %arg5[%c0_2, %c0_3] : memref<3x256xf32, #tpu.memory_space<vmem>>, vector<3x256xf32>
    %3 = vector.extract_strided_slice %2 {offsets = [0, 0], sizes = [1, 256], strides = [1, 1]} : vector<3x256xf32> to vector<1x256xf32>
    %4 = vector.extract_strided_slice %2 {offsets = [1, 0], sizes = [1, 256], strides = [1, 1]} : vector<3x256xf32> to vector<1x256xf32>
    %5 = vector.extract_strided_slice %2 {offsets = [2, 0], sizes = [1, 256], strides = [1, 1]} : vector<3x256xf32> to vector<1x256xf32>
    %c0_4 = arith.constant 0 : index
    %c0_5 = arith.constant 0 : index
    %6 = vector.load %arg6[%c0_4, %c0_5] : memref<3x128xf32, #tpu.memory_space<vmem>>, vector<3x128xf32>
    %7 = vector.extract_strided_slice %6 {offsets = [0, 0], sizes = [1, 128], strides = [1, 1]} : vector<3x128xf32> to vector<1x128xf32>
    %8 = vector.extract_strided_slice %6 {offsets = [1, 0], sizes = [1, 128], strides = [1, 1]} : vector<3x128xf32> to vector<1x128xf32>
    %9 = vector.extract_strided_slice %6 {offsets = [2, 0], sizes = [1, 128], strides = [1, 1]} : vector<3x128xf32> to vector<1x128xf32>
    %10 = arith.truncf %1 : vector<4x48xf32> to vector<4x48xbf16>
    %c0_6 = arith.constant 0 : index
    %c0_7 = arith.constant 0 : index
    %11 = vector.load %arg2[%c0_6, %c0_7] : memref<48x256xbf16, #tpu.memory_space<vmem>>, vector<48x256xbf16>
    %cst = arith.constant dense<0.000000e+00> : vector<4x256xf32>
    %12 = tpu.matmul %10, %11, %cst {dimension_numbers = #tpu.dot_dimension_numbers<[1], [0], [0], [1], [0, 0, 1, 1], [], []>} : vector<4x48xbf16>, vector<48x256xbf16>, vector<4x256xf32> -> vector<4x256xf32>
    %13 = vector.broadcast %3 : vector<1x256xf32> to vector<4x256xf32>
    %14 = arith.addf %12, %13 : vector<4x256xf32>
    %cst_8 = arith.constant 0.000000e+00 : f32
    %15 = vector.broadcast %cst_8 : f32 to vector<4x256xf32>
    %16 = arith.cmpf oge, %14, %15 : vector<4x256xf32>
    %cst_9 = arith.constant 2.000000e-01 : f32
    %17 = vector.broadcast %cst_9 : f32 to vector<4x256xf32>
    %18 = arith.mulf %17, %14 : vector<4x256xf32>
    %19 = arith.select %16, %14, %18 : vector<4x256xi1>, vector<4x256xf32>
    %cst_10 = arith.constant dense<0.000000e+00> : vector<256xf32>
    %20 = vector.multi_reduction <add>, %19, %cst_10 [0] : vector<4x256xf32> to vector<256xf32>
    %21 = vector.shape_cast %20 : vector<256xf32> to vector<1x256xf32>
    %cst_11 = arith.constant 4.000000e+00 : f32
    %22 = vector.broadcast %cst_11 : f32 to vector<1x256xf32>
    %23 = arith.divf %21, %22 : vector<1x256xf32>
    %24 = vector.broadcast %23 : vector<1x256xf32> to vector<4x256xf32>
    %25 = arith.subf %19, %24 : vector<4x256xf32>
    %26 = arith.mulf %25, %25 : vector<4x256xf32>
    %cst_12 = arith.constant dense<0.000000e+00> : vector<256xf32>
    %27 = vector.multi_reduction <add>, %26, %cst_12 [0] : vector<4x256xf32> to vector<256xf32>
    %28 = vector.shape_cast %27 : vector<256xf32> to vector<1x256xf32>
    %cst_13 = arith.constant 3.000000e+00 : f32
    %29 = vector.broadcast %cst_13 : f32 to vector<1x256xf32>
    %30 = arith.divf %28, %29 : vector<1x256xf32>
    %cst_14 = arith.constant 9.99999993E-9 : f32
    %31 = vector.broadcast %cst_14 : f32 to vector<1x256xf32>
    %32 = arith.addf %30, %31 : vector<1x256xf32>
    %33 = math.sqrt %32 : vector<1x256xf32>
    %cst_15 = arith.constant dense<0.000000e+00> : vector<1xf32>
    %34 = vector.multi_reduction <add>, %33, %cst_15 [1] : vector<1x256xf32> to vector<1xf32>
    %35 = vector.shape_cast %34 : vector<1xf32> to vector<1x1xf32>
    %cst_16 = arith.constant 2.560000e+02 : f32
    %36 = vector.broadcast %cst_16 : f32 to vector<1x1xf32>
    %37 = arith.divf %35, %36 : vector<1x1xf32>
    %38 = vector.broadcast %37 : vector<1x1xf32> to vector<1x256xf32>
    %39 = arith.mulf %38, %4 : vector<1x256xf32>
    %40 = arith.truncf %19 : vector<4x256xf32> to vector<4x256xbf16>
    %c0_17 = arith.constant 0 : index
    %c0_18 = arith.constant 0 : index
    %41 = vector.load %arg3[%c0_17, %c0_18] : memref<256x256xbf16, #tpu.memory_space<vmem>>, vector<256x256xbf16>
    %cst_19 = arith.constant dense<0.000000e+00> : vector<4x256xf32>
    %42 = tpu.matmul %40, %41, %cst_19 {dimension_numbers = #tpu.dot_dimension_numbers<[1], [0], [0], [1], [0, 0, 1, 1], [], []>} : vector<4x256xbf16>, vector<256x256xbf16>, vector<4x256xf32> -> vector<4x256xf32>
    %43 = vector.broadcast %39 : vector<1x256xf32> to vector<4x256xf32>
    %44 = arith.addf %42, %43 : vector<4x256xf32>
    %45 = vector.broadcast %5 : vector<1x256xf32> to vector<4x256xf32>
    %46 = arith.addf %44, %45 : vector<4x256xf32>
    %cst_20 = arith.constant 0.000000e+00 : f32
    %47 = vector.broadcast %cst_20 : f32 to vector<4x256xf32>
    %48 = arith.cmpf oge, %46, %47 : vector<4x256xf32>
    %cst_21 = arith.constant 2.000000e-01 : f32
    %49 = vector.broadcast %cst_21 : f32 to vector<4x256xf32>
    %50 = arith.mulf %49, %46 : vector<4x256xf32>
    %51 = arith.select %48, %46, %50 : vector<4x256xi1>, vector<4x256xf32>
    %52 = arith.truncf %51 : vector<4x256xf32> to vector<4x256xbf16>
    %c0_22 = arith.constant 0 : index
    %c0_23 = arith.constant 0 : index
    %53 = vector.load %arg4[%c0_22, %c0_23] : memref<256x128xbf16, #tpu.memory_space<vmem>>, vector<256x128xbf16>
    %cst_24 = arith.constant dense<0.000000e+00> : vector<4x128xf32>
    %54 = tpu.matmul %52, %53, %cst_24 {dimension_numbers = #tpu.dot_dimension_numbers<[1], [0], [0], [1], [0, 0, 1, 1], [], []>} : vector<4x256xbf16>, vector<256x128xbf16>, vector<4x128xf32> -> vector<4x128xf32>
    %55 = vector.broadcast %7 : vector<1x128xf32> to vector<4x128xf32>
    %56 = arith.addf %54, %55 : vector<4x128xf32>
    %cst_25 = arith.constant 0.000000e+00 : f32
    %57 = vector.broadcast %cst_25 : f32 to vector<4x128xf32>
    %58 = arith.cmpf oge, %56, %57 : vector<4x128xf32>
    %cst_26 = arith.constant 2.000000e-01 : f32
    %59 = vector.broadcast %cst_26 : f32 to vector<4x128xf32>
    %60 = arith.mulf %59, %56 : vector<4x128xf32>
    %61 = arith.select %58, %56, %60 : vector<4x128xi1>, vector<4x128xf32>
    %62 = vector.broadcast %8 : vector<1x128xf32> to vector<4x128xf32>
    %63 = arith.mulf %61, %62 : vector<4x128xf32>
    %cst_27 = arith.constant dense<0.000000e+00> : vector<4xf32>
    %64 = vector.multi_reduction <add>, %63, %cst_27 [1] : vector<4x128xf32> to vector<4xf32>
    %65 = vector.shape_cast %64 : vector<4xf32> to vector<4x1xf32>
    %66 = tpu.iota {dimensions = array<i32: 1>} : vector<4x128xi32>
    %c16_i32 = arith.constant 16 : i32
    %67 = vector.broadcast %c16_i32 : i32 to vector<4x128xi32>
    %68 = arith.cmpi eq, %66, %67 : vector<4x128xi32>
    %69 = vector.shape_cast %65 : vector<4x1xf32> to vector<4x1xf32>
    %70 = vector.broadcast %69 : vector<4x1xf32> to vector<4x128xf32>
    %71 = arith.select %68, %70, %61 : vector<4x128xi1>, vector<4x128xf32>
    %72 = vector.broadcast %9 : vector<1x128xf32> to vector<4x128xf32>
    %73 = arith.addf %71, %72 : vector<4x128xf32>
    %c0_28 = arith.constant 0 : index
    %c0_29 = arith.constant 0 : index
    %c0_30 = arith.constant 0 : index
    %74 = vector.load %arg7[%c0_28, %c0_29, %c0_30] : memref<1x4x128xf32, #tpu.memory_space<vmem>>, vector<1x4x128xf32>
    %75 = vector.shape_cast %74 : vector<1x4x128xf32> to vector<4x128xf32>
    %76 = vector.shape_cast %73 : vector<4x128xf32> to vector<1x4x128xf32>
    tpu.vector_store %arg7[%c0_28, %c0_29, %c0_30], %76 {strides = array<i32>} : memref<1x4x128xf32, #tpu.memory_space<vmem>>, vector<1x4x128xf32>,
    return
  }
  func.func @transform_0(%arg0: i32) -> (i32, i32, i32) {
    %c0_i32 = arith.constant 0 : i32
    %c0_i32_0 = arith.constant 0 : i32
    %c0_i32_1 = arith.constant 0 : i32
    return %arg0, %c0_i32, %c0_i32_0 : i32, i32, i32
  }
  func.func @transform_1(%arg0: i32) -> (i32, i32) {
    %c0_i32 = arith.constant 0 : i32
    %c0_i32_0 = arith.constant 0 : i32
    %c0_i32_1 = arith.constant 0 : i32
    return %c0_i32, %c0_i32_0 : i32, i32
  }
  func.func @transform_2(%arg0: i32) -> (i32, i32) {
    %c0_i32 = arith.constant 0 : i32
    %c0_i32_0 = arith.constant 0 : i32
    %c0_i32_1 = arith.constant 0 : i32
    return %c0_i32, %c0_i32_0 : i32, i32
  }
  func.func @transform_3(%arg0: i32) -> (i32, i32) {
    %c0_i32 = arith.constant 0 : i32
    %c0_i32_0 = arith.constant 0 : i32
    %c0_i32_1 = arith.constant 0 : i32
    return %c0_i32, %c0_i32_0 : i32, i32
  }
  func.func @transform_4(%arg0: i32) -> (i32, i32) {
    %c0_i32 = arith.constant 0 : i32
    %c0_i32_0 = arith.constant 0 : i32
    %c0_i32_1 = arith.constant 0 : i32
    return %c0_i32, %c0_i32_0 : i32, i32
  }
  func.func @transform_5(%arg0: i32) -> (i32, i32) {
    %c0_i32 = arith.constant 0 : i32
    %c0_i32_0 = arith.constant 0 : i32
    %c0_i32_1 = arith.constant 0 : i32
    return %c0_i32, %c0_i32_0 : i32, i32
  }
  func.func @transform_6(%arg0: i32) -> (i32, i32, i32) {
    %c0_i32 = arith.constant 0 : i32
    %c0_i32_0 = arith.constant 0 : i32
    %c0_i32_1 = arith.constant 0 : i32
    return %arg0, %c0_i32, %c0_i32_0 : i32, i32, i32
  }
}

</mosaic_0001>

<bundles_post_ra>
// kernel: _dnet_forward_core.1
= control target key start
LH: loop header
LB: loop body
LE: loop exit
PB: predicated region body
PF: predicated region fallthrough
CT: control target
= control target key end

     0   :  { %s1260_s21 = smov 0   ;;  %s1584_s0 = inlined_call_operand.vmem [shape: f32[4,4,48], index: 0, kind: input, shape index: {}]   ;;  %s1585_s1 = inlined_call_operand.vmem [shape: bf16[48,256], index: 1, kind: input, shape index: {}]   ;;  %s1586_s2 = inlined_call_operand.vmem [shape: bf16[256,256], index: 2, kind: input, shape index: {}]   ;;  %s1587_s3 = inlined_call_operand.vmem [shape: bf16[256,128], index: 3, kind: input, shape index: {}]   ;;  %s1588_s4 = inlined_call_operand.vmem [shape: f32[3,256], index: 4, kind: input, shape index: {}]   ;;  %s1589_s5 = inlined_call_operand.vmem [shape: f32[3,128], index: 5, kind: input, shape index: {}]   ;;  %s1590_s6 = inlined_call_operand.vmem [shape: f32[4,4,128], index: 6, kind: output, shape index: {}]  }
   0x1 LB: > { %s912_s22 = sadd.s32 4294967295, %s1220_s21   ;;  %p916_p0 = scmp.ge.s32.totalorder %s1220_s21, 1  ;;  %s1220_s21 = sphi %s1260_s21, %s16_s21  }
   0x2   : > { %p211_p1 = scmp.lt.s32.totalorder %s1220_s21, 5 }
   0x4   : > { %p212_p2 = pnand %p916_p0, %p211_p1 }
   0x5   : > { %p239_p3 = scmp.lt.s32.totalorder (!%p212_p2), %s912_s22, 3 }
   0x6   : > { %215 = sbr.rel (%p212_p2) target bundleno = 613 (0x265), region = 44 }
   0xb   : > { %v937_v0 = vld [vmem:[%s1585_s1 + $0x20] sm:$0xf]  ;;  %v1144_v1 = vld [vmem:[%s1585_s1 + $0x24] sm:$0xf0]  ;;  %v1143_v2 = vld [vmem:[%s1585_s1 + $0x24] sm:$0xf] }
   0xc   : > { %v938_v3 = vor.u32 %v1144_v1, %v937_v0  ;;  %v939_v4 = vld [vmem:[%s1585_s1 + $0x28] sm:$0xf0]  ;;  %v929_v5 = vld [vmem:[%s1585_s1 + $0x10] sm:$0xf]  ;;  %v1142_v6 = vld [vmem:[%s1585_s1 + $0x14] sm:$0xf0] }
   0xd   : > { %v942_v7 = vor.u32 %v1143_v2, %v939_v4  ;;  %v1141_v8 = vld [vmem:[%s1585_s1 + $0x14] sm:$0xf]  ;;  %v931_v9 = vld [vmem:[%s1585_s1 + $0x18] sm:$0xf0]  ;;  %v921_v10 = vld [vmem:[%s1585_s1] sm:$0xf]  ;;  %v930_v11 = vor.u32 %v1142_v6, %v929_v5 }
   0xe   : > { %304 = vmatpush.bf16.msra.mxu0 %v938_v3  ;;  %v1140_v12 = vld [vmem:[%s1585_s1 + $0x4] sm:$0xf0]  ;;  %v1139_v13 = vld [vmem:[%s1585_s1 + $0x4] sm:$0xf]  ;;  %v923_v14 = vld [vmem:[%s1585_s1 + $0x8] sm:$0xf0]  ;;  %v934_v15 = vor.u32 %v1141_v8, %v931_v9 }
   0xf   : > { %317 = vmatpush.bf16.msra.mxu1 %v942_v7  ;;  %v1003_v16 = vld [vmem:[%s1586_s2 + $0x70] sm:$0xf]  ;;  %v1160_v17 = vld [vmem:[%s1586_s2 + $0x74] sm:$0xf0]  ;;  %v1159_v21 = vld [vmem:[%s1586_s2 + $0x74] sm:$0xf]  ;;  %v922_v25 = vor.u32 %v1140_v12, %v921_v10  ;;  %v926_v29 = vor.u32 %v1139_v13, %v923_v14 }
  0x10   : > { %v1004_v18 = vor.u32 %v1160_v17, %v1003_v16  ;;  %v1067_v19 = vld [vmem:[%s1586_s2 + $0xf0] sm:$0xf]  ;;  %v1176_v20 = vld [vmem:[%s1586_s2 + $0xf4] sm:$0xf0]  ;;  %s1592_s22 = smov (!%p239_p3, %s912_s22), 3  ;;  %vm295_vm0 = vcmask 392192  }
  0x11   : > { %v1068_v22 = vor.u32 %v1176_v20, %v1067_v19  ;;  %v1005_v23 = vld [vmem:[%s1586_s2 + $0x78] sm:$0xf0]  ;;  %v1175_v24 = vld [vmem:[%s1586_s2 + $0xf4] sm:$0xf]  ;;  %v995_v27 = vld [vmem:[%s1586_s2 + $0x60] sm:$0xf] }
  0x12   : > { %305 = vmatpush.bf16.msra.mxu0 %v930_v11  ;;  %621 = vmatpush.bf16.msra.mxu2 %v1004_v18  ;;  %v1069_v26 = vld [vmem:[%s1586_s2 + $0xf8] sm:$0xf0]  ;;  %v1158_v28 = vld [vmem:[%s1586_s2 + $0x64] sm:$0xf0]  ;;  %s917_s23 = sshll.u32 %s1592_s22, 2  ;;  %v1008_v30 = vor.u32 %v1159_v21, %v1005_v23  ;;  %vm331_vm2 = vcmask 1043456  }
  0x13   : > { %318 = vmatpush.bf16.msra.mxu1 %v934_v15  ;;  %634 = vmatpush.bf16.msra.mxu3 %v1068_v22  ;;  %v996_v31 = vor.u32 %v1158_v28, %v995_v27  ;;  %v1059_v32 = vld [vmem:[%s1586_s2 + $0xe0] sm:$0xf]  ;;  %v1174_v33 = vld [vmem:[%s1586_s2 + $0xe4] sm:$0xf0]  ;;  %s242_s30 = scalar_lea.vmem %s1584_s0, %s917_s23  ;;  %v1072_v34 = vor.u32 %v1175_v24, %v1069_v26  ;;  %v1157_v36 = vld [vmem:[%s1586_s2 + $0x64] sm:$0xf]  ;;  %s246_s26 = scalar_lea.vmem %s1590_s6, %s917_s23 }
  0x14   : > { %v1060_v35 = vor.u32 %v1174_v33, %v1059_v32  ;;  %v997_v37 = vld [vmem:[%s1586_s2 + $0x68] sm:$0xf0]  ;;  %v1173_v38 = vld [vmem:[%s1586_s2 + $0xe4] sm:$0xf]  ;;  %v248_v39 = vld [vmem:[%s242_s30] sm:$0xf] }
  0x15   : > { %v1061_v40 = vld [vmem:[%s1586_s2 + $0xe8] sm:$0xf0]  ;;  %v987_v41 = vld [vmem:[%s1586_s2 + $0x50] sm:$0xf]  ;;  %v251_v42 = vpack.c.bf16 %v248_v39, %v248_v39  ;;  %v1156_v43 = vld [vmem:[%s1586_s2 + $0x54] sm:$0xf0]  ;;  %v1000_v46 = vor.u32 %v1157_v36, %v997_v37 }
  0x16   : > { %306 = vmatpush.bf16.msra.mxu0 %v922_v25  ;;  %622 = vmatpush.bf16.msra.mxu2 %v996_v31  ;;  %v1051_v44 = vld [vmem:[%s1586_s2 + $0xd0] sm:$0xf]  ;;  %v1172_v45 = vld [vmem:[%s1586_s2 + $0xd4] sm:$0xf0]  ;;  %v988_v47 = vor.u32 %v1156_v43, %v987_v41  ;;  %v1155_v48 = vld [vmem:[%s1586_s2 + $0x54] sm:$0xf]  ;;  %v1064_v50 = vor.u32 %v1173_v38, %v1061_v40 }
  0x17   : > { %319 = vmatpush.bf16.msra.mxu1 %v926_v29  ;;  %v989_v49 = vld [vmem:[%s1586_s2 + $0x58] sm:$0xf0]  ;;  %635 = vmatpush.bf16.msra.mxu3 %v1060_v35  ;;  %v1052_v51 = vor.u32 %v1172_v45, %v1051_v44  ;;  %v1171_v52 = vld [vmem:[%s1586_s2 + $0xd4] sm:$0xf]  ;;  %v979_v53 = vld [vmem:[%s1586_s2 + $0x40] sm:$0xf] }
  0x18   : > { %v1154_v54 = vld [vmem:[%s1586_s2 + $0x44] sm:$0xf0]  ;;  %v1053_v55 = vld [vmem:[%s1586_s2 + $0xd8] sm:$0xf0]  ;;  %v1043_v56 = vld [vmem:[%s1586_s2 + $0xc0] sm:$0xf]  ;;  %v992_v59 = vor.u32 %v1155_v48, %v989_v49 }
  0x19   : > { %943 = vmatmul.msk.bf16.vlgmr.msra.gmra.mxu0 %vm295_vm0, %v251_v42  ;;  %v1170_v57 = vld [vmem:[%s1586_s2 + $0xc4] sm:$0xf0]  ;;  %v980_v58 = vor.u32 %v1154_v54, %v979_v53  ;;  %v971_v60 = vld [vmem:[%s1586_s2 + $0x30] sm:$0xf]  ;;  %v1152_v61 = vld [vmem:[%s1586_s2 + $0x34] sm:$0xf0]  ;;  %v1056_v62 = vor.u32 %v1171_v52, %v1053_v55 }
  0x1a   : > { %647 = vmatpush.bf16.msrb.mxu0 %v1008_v30  ;;  %944 = vmatmul.msk.bf16.vlgmr.msra.gmra.mxu1 %vm295_vm0, %v251_v42  ;;  %v1044_v63 = vor.u32 %v1170_v57, %v1043_v56  ;;  %v1153_v0 = vld [vmem:[%s1586_s2 + $0x44] sm:$0xf]  ;;  %v981_v1 = vld [vmem:[%s1586_s2 + $0x48] sm:$0xf0]  ;;  %v1035_v4 = vld [vmem:[%s1586_s2 + $0xb0] sm:$0xf]  ;;  %v972_v6 = vor.u32 %v1152_v61, %v971_v60 }
  0x1b   : > { %660 = vmatpush.bf16.msrb.mxu1 %v1072_v34  ;;  %623 = vmatpush.bf16.msra.mxu2 %v988_v47  ;;  %v1169_v2 = vld [vmem:[%s1586_s2 + $0xc4] sm:$0xf]  ;;  %v1045_v3 = vld [vmem:[%s1586_s2 + $0xc8] sm:$0xf0]  ;;  %v1168_v5 = vld [vmem:[%s1586_s2 + $0xb4] sm:$0xf0]  ;;  %v984_v7 = vor.u32 %v1153_v0, %v981_v1 }
  0x1c   : > { %636 = vmatpush.bf16.msra.mxu3 %v1052_v51  ;;  %v963_v8 = vld [vmem:[%s1586_s2 + $0x20] sm:$0xf]  ;;  %v1150_v9 = vld [vmem:[%s1586_s2 + $0x24] sm:$0xf0]  ;;  %v1048_v10 = vor.u32 %v1169_v2, %v1045_v3  ;;  %v1036_v11 = vor.u32 %v1168_v5, %v1035_v4  ;;  %v1151_v12 = vld [vmem:[%s1586_s2 + $0x34] sm:$0xf] }
  0x1d   : > { %v973_v13 = vld [vmem:[%s1586_s2 + $0x38] sm:$0xf0]  ;;  %v1167_v14 = vld [vmem:[%s1586_s2 + $0xb4] sm:$0xf]  ;;  %v1027_v16 = vld [vmem:[%s1586_s2 + $0xa0] sm:$0xf]  ;;  %v964_v18 = vor.u32 %v1150_v9, %v963_v8 }
  0x1e   : > { %648 = vmatpush.bf16.msrb.mxu0 %v1000_v46  ;;  %v1037_v15 = vld [vmem:[%s1586_s2 + $0xb8] sm:$0xf0]  ;;  %v1166_v17 = vld [vmem:[%s1586_s2 + $0xa4] sm:$0xf0]  ;;  %v976_v19 = vor.u32 %v1151_v12, %v973_v13  ;;  %v1149_v22 = vld [vmem:[%s1586_s2 + $0x24] sm:$0xf] }
  0x1f   : > { %661 = vmatpush.bf16.msrb.mxu1 %v1064_v50  ;;  %624 = vmatpush.bf16.msra.mxu2 %v980_v58  ;;  %v1040_v20 = vor.u32 %v1167_v14, %v1037_v15  ;;  %v1028_v21 = vor.u32 %v1166_v17, %v1027_v16  ;;  %v965_v23 = vld [vmem:[%s1586_s2 + $0x28] sm:$0xf0]  ;;  %v1165_v24 = vld [vmem:[%s1586_s2 + $0xa4] sm:$0xf]  ;;  %v955_v28 = vld [vmem:[%s1586_s2 + $0x10] sm:$0xf] }
  0x20   : > { %637 = vmatpush.bf16.msra.mxu3 %v1044_v63  ;;  %v1029_v25 = vld [vmem:[%s1586_s2 + $0xa8] sm:$0xf0]  ;;  %v968_v26 = vor.u32 %v1149_v22, %v965_v23  ;;  %v1148_v29 = vld [vmem:[%s1586_s2 + $0x14] sm:$0xf0]  ;;  %v1019_v30 = vld [vmem:[%s1586_s2 + $0x90] sm:$0xf] }
  0x21   : > { %v1032_v27 = vor.u32 %v1165_v24, %v1029_v25  ;;  %v956_v31 = vor.u32 %v1148_v29, %v955_v28  ;;  %v1164_v32 = vld [vmem:[%s1586_s2 + $0x94] sm:$0xf0]  ;;  %v1147_v33 = vld [vmem:[%s1586_s2 + $0x14] sm:$0xf]  ;;  %v957_v35 = vld [vmem:[%s1586_s2 + $0x18] sm:$0xf0] }
  0x22   : > { %649 = vmatpush.bf16.msrb.mxu0 %v992_v59  ;;  %v1020_v34 = vor.u32 %v1164_v32, %v1019_v30  ;;  %v1163_v36 = vld [vmem:[%s1586_s2 + $0x94] sm:$0xf]  ;;  %v1021_v37 = vld [vmem:[%s1586_s2 + $0x98] sm:$0xf0]  ;;  %v960_v38 = vor.u32 %v1147_v33, %v957_v35  ;;  %v947_v40 = vld [vmem:[%s1586_s2] sm:$0xf] }
  0x23   : > { %662 = vmatpush.bf16.msrb.mxu1 %v1056_v62  ;;  %625 = vmatpush.bf16.msra.mxu2 %v972_v6  ;;  %v1024_v39 = vor.u32 %v1163_v36, %v1021_v37  ;;  %v1146_v41 = vld [vmem:[%s1586_s2 + $0x4] sm:$0xf0]  ;;  %v1011_v42 = vld [vmem:[%s1586_s2 + $0x80] sm:$0xf]  ;;  %v1145_v45 = vld [vmem:[%s1586_s2 + $0x4] sm:$0xf] }
  0x24   : > { %638 = vmatpush.bf16.msra.mxu3 %v1036_v11  ;;  %v948_v43 = vor.u32 %v1146_v41, %v947_v40  ;;  %v1162_v44 = vld [vmem:[%s1586_s2 + $0x84] sm:$0xf0]  ;;  %v949_v46 = vld [vmem:[%s1586_s2 + $0x8] sm:$0xf0]  ;;  %v1161_v49 = vld [vmem:[%s1586_s2 + $0x84] sm:$0xf] }
  0x25   : > { %v1012_v47 = vor.u32 %v1162_v44, %v1011_v42  ;;  %v952_v48 = vor.u32 %v1145_v45, %v949_v46  ;;  %v1013_v50 = vld [vmem:[%s1586_s2 + $0x88] sm:$0xf0]  ;;  %v1513_v52 = vld [vmem:[%s1588_s4] sm:$0x77]  ;;  %v1222_v53 = vmov 4.0   ;;  %v1223_v15 = vmov 3.0  }
  0x26   : > { %650 = vmatpush.bf16.msrb.mxu0 %v984_v7  ;;  %v1016_v51 = vor.u32 %v1161_v49, %v1013_v50  ;;  %1204 = vrcp.f32 %v1222_v53  ;;  %v259_v54 = vperm.slane %v1513_v52, 0  ;;  %v260_v55 = vperm.slane %v1513_v52, 4 }
  0x27   : > { %663 = vmatpush.bf16.msrb.mxu1 %v1048_v10  ;;  %626 = vmatpush.bf16.msra.mxu2 %v964_v18  ;;  %1206 = vrcp.f32 %v1223_v15  ;;  %v1184_v15 = vld [vmem:[%s1587_s3 + $0x38] sm:$0xff] }
  0x28   : > { %639 = vmatpush.bf16.msra.mxu3 %v1028_v21  ;;  %v263_v57 = vperm.slane %v259_v54, 0  ;;  %v264_v58 = vperm.slane %v260_v55, 0 }
  0x2a   : > { %651 = vmatpush.bf16.msrb.mxu0 %v976_v19 }
  0x2b   : > { %664 = vmatpush.bf16.msrb.mxu1 %v1040_v20  ;;  %627 = vmatpush.bf16.msra.mxu2 %v956_v31 }
  0x2c   : > { %640 = vmatpush.bf16.msra.mxu3 %v1020_v34  ;;  %v1205_v56 = vpop.eup %1204 }
  0x2d   : > { %v347_v60 = vmul.f32 4.0, %v1205_v56  ;;  %vm351_vm4 = vweird.f32 %v1205_v56  ;;  %v1207_v23 = vpop.eup %1206 }
  0x2e   : > { %652 = vmatpush.bf16.msrb.mxu0 %v968_v26  ;;  %v374_v29 = vmul.f32 3.0, %v1207_v23  ;;  %vm378_vm5 = vweird.f32 %v1207_v23 }
  0x2f   : > { %665 = vmatpush.bf16.msrb.mxu1 %v1032_v27  ;;  %628 = vmatpush.bf16.msra.mxu2 %v948_v43  ;;  %v348_v2 = vsub.f32 1.0, %v347_v60 }
  0x30   : > { %641 = vmatpush.bf16.msra.mxu3 %v1012_v47  ;;  %v375_v34 = vsub.f32 1.0, %v374_v29  ;;  %v1181_v29 = vld [vmem:[%s1587_s3 + $0x20] sm:$0xff] }
  0x31   : > { %v349_v11 = vmul.f32 %v1205_v56, %v348_v2 }
  0x32   : > { %653 = vmatpush.bf16.msrb.mxu0 %v960_v38 }
  0x33   : > { %666 = vmatpush.bf16.msrb.mxu1 %v1024_v39  ;;  %v350_v18 = vadd.f32 %v1205_v56, %v349_v11  ;;  %v376_v39 = vmul.f32 %v1207_v23, %v375_v34  ;;  %818 = vmatpush.bf16.msrb.mxu2 %v1184_v15  ;;  %v1179_v34 = vld [vmem:[%s1587_s3 + $0x10] sm:$0xff] }
  0x35   : > { %v352_v24 = vsel %vm351_vm4, %v1205_v56, %v350_v18  ;;  %v377_v44 = vadd.f32 %v1207_v23, %v376_v39  ;;  %v1191_v18 = vld [vmem:[%s1587_s3 + $0x70] sm:$0xff]  ;;  %v1177_v39 = vld [vmem:[%s1587_s3] sm:$0xff] }
  0x36   : > { %654 = vmatpush.bf16.msrb.mxu0 %v952_v48 }
  0x37   : > { %667 = vmatpush.bf16.msrb.mxu1 %v1016_v51  ;;  %v379_v49 = vsel %vm378_vm5, %v1207_v23, %v377_v44 }
  0x96   : > { %v308_v59 = vpop.f32.mrf.mxu0 }
  0x97   : > { %v309_v61 = vadd.f32 %v308_v59, %v263_v57  ;;  %v321_v62 = vpop.f32.mrf.mxu1 }
  0x98   : > { %v322_v63 = vadd.f32 %v321_v62, %v264_v58 }
  0x99   : > { %vm325_vm1 = vcmp.ge.f32.partialorder %v309_v61, 0.0  ;;  %v327_v0 = vmul.f32 0.2, %v309_v61 }
  0x9a   : > { %vm326_vm3 = vcmp.ge.f32.partialorder %v322_v63, 0.0  ;;  %v328_v1 = vmul.f32 0.2, %v322_v63 }
  0x9b   : > { %v329_v3 = vsel %vm325_vm1, %v309_v61, %v327_v0 }
  0x9c   : > { %v332_v4 = vsel %vm331_vm2, %v329_v3, 0.0  ;;  %v420_v5 = vpack.c.bf16 %v329_v3, %v329_v3  ;;  %v330_v6 = vsel %vm326_vm3, %v322_v63, %v328_v1 }
  0x9d   : > { %v333_v7 = vrot.slane %v332_v4, 4  ;;  %v339_v8 = vsel %vm331_vm2, %v330_v6, 0.0  ;;  %v421_v9 = vpack.c.bf16 %v330_v6, %v330_v6 }
  0x9e   : > { %v310_v10 = vpop.f32.mrf.mxu0  ;;  %629 = vmatmul.bf16.vlgmr.msra.gmra.mxu2 %v420_v5  ;;  %v340_v12 = vrot.slane %v339_v8, 4  ;;  %655 = vmatmul.bf16.vlgmr.msrb.gmra.mxu0 %v420_v5 }
  0x9f   : > { %v323_v13 = vpop.f32.mrf.mxu1  ;;  %v334_v14 = vadd.f32 %v333_v7, %v332_v4  ;;  %642 = vmatmul.bf16.vlgmr.msra.gmra.mxu3 %v421_v9  ;;  %668 = vmatmul.bf16.vlgmr.msrb.gmra.mxu1 %v421_v9 }
  0xa0   : > { %v341_v16 = vadd.f32 %v340_v12, %v339_v8 }
  0xa1   : > { %v335_v17 = vrot.slane %v334_v14, 2 }
  0xa2   : > { %v342_v19 = vrot.slane %v341_v16, 2 }
  0xa3   : > { %v336_v20 = vadd.f32 %v335_v17, %v334_v14  ;;  %v1183_v17 = vld [vmem:[%s1587_s3 + $0x30] sm:$0xff] }
  0xa4   : > { %v343_v21 = vadd.f32 %v342_v19, %v341_v16  ;;  %v1192_v16 = vld [vmem:[%s1587_s3 + $0x78] sm:$0xff]  ;;  %819 = vmatpush.bf16.msrb.mxu2 %v1183_v17  ;;  %v1182_v19 = vld [vmem:[%s1587_s3 + $0x28] sm:$0xff] }
  0xa5   : > { %v337_v22 = vrot.slane %v336_v20, 1  ;;  %831 = vmatpush.bf16.msrb.mxu3 %v1192_v16 }
  0xa6   : > { %v344_v25 = vrot.slane %v343_v21, 1 }
  0xa7   : > { %v338_v26 = vadd.f32 %v337_v22, %v336_v20  ;;  %v1190_v20 = vld [vmem:[%s1587_s3 + $0x68] sm:$0xff] }
  0xa8   : > { %v345_v27 = vadd.f32 %v344_v25, %v343_v21  ;;  %820 = vmatpush.bf16.msrb.mxu2 %v1182_v19 }
  0xa9   : > { %v353_v28 = vmul.f32 %v352_v24, %v338_v26  ;;  %832 = vmatpush.bf16.msrb.mxu3 %v1191_v18  ;;  %v852_v18 = vlaneseq }
  0xaa   : > { %v354_v30 = vmul.f32 %v352_v24, %v345_v27 }
  0xab   : > { %v355_v31 = vsub.f32 %v329_v3, %v353_v28  ;;  %v853_v19 = vand.u32 127, %v852_v18 }
  0xac   : > { %v356_v32 = vsub.f32 %v330_v6, %v354_v30  ;;  %v1189_v30 = vld [vmem:[%s1587_s3 + $0x60] sm:$0xff]  ;;  %821 = vmatpush.bf16.msrb.mxu2 %v1181_v29 }
  0xad   : > { %v357_v33 = vmul.f32 %v355_v31, %v355_v31  ;;  %833 = vmatpush.bf16.msrb.mxu3 %v1190_v20  ;;  %v1180_v31 = vld [vmem:[%s1587_s3 + $0x18] sm:$0xff]  ;;  %vm854_vm14 = vcmp.eq.s32.totalorder %v853_v19, 16 }
  0xae   : > { %v358_v35 = vmul.f32 %v356_v32, %v356_v32  ;;  %v1188_v32 = vld [vmem:[%s1587_s3 + $0x58] sm:$0xff] }
  0xaf   : > { %v359_v36 = vsel %vm331_vm2, %v357_v33, 0.0  ;;  %v1224_v33 = vmov 256.0  }
  0xb0   : > { %v360_v37 = vrot.slane %v359_v36, 4  ;;  %v366_v38 = vsel %vm331_vm2, %v358_v35, 0.0  ;;  %822 = vmatpush.bf16.msrb.mxu2 %v1180_v31  ;;  %v1187_v35 = vld [vmem:[%s1587_s3 + $0x50] sm:$0xff] }
  0xb1   : > { %v367_v40 = vrot.slane %v366_v38, 4  ;;  %834 = vmatpush.bf16.msrb.mxu3 %v1189_v30 }
  0xb2   : > { %v361_v41 = vadd.f32 %v360_v37, %v359_v36  ;;  %v1178_v37 = vld [vmem:[%s1587_s3 + $0x8] sm:$0xff] }
  0xb3   : > { %v368_v42 = vadd.f32 %v367_v40, %v366_v38  ;;  %v1186_v38 = vld [vmem:[%s1587_s3 + $0x48] sm:$0xff]  ;;  %v1185_v40 = vld [vmem:[%s1587_s3 + $0x40] sm:$0xff] }
  0xb4   : > { %v362_v43 = vrot.slane %v361_v41, 2  ;;  %823 = vmatpush.bf16.msrb.mxu2 %v1179_v34 }
  0xb5   : > { %v369_v45 = vrot.slane %v368_v42, 2  ;;  %835 = vmatpush.bf16.msrb.mxu3 %v1188_v32 }
  0xb6   : > { %v363_v46 = vadd.f32 %v362_v43, %v361_v41 }
  0xb7   : > { %v370_v47 = vadd.f32 %v369_v45, %v368_v42 }
  0xb8   : > { %v364_v48 = vrot.slane %v363_v46, 1  ;;  %824 = vmatpush.bf16.msrb.mxu2 %v1178_v37 }
  0xb9   : > { %v371_v50 = vrot.slane %v370_v47, 1  ;;  %836 = vmatpush.bf16.msrb.mxu3 %v1187_v35 }
  0xba   : > { %v365_v51 = vadd.f32 %v364_v48, %v363_v46 }
  0xbb   : > { %v372_v53 = vadd.f32 %v371_v50, %v370_v47 }
  0xbc   : > { %v380_v54 = vmul.f32 %v379_v49, %v365_v51  ;;  %825 = vmatpush.bf16.msrb.mxu2 %v1177_v39  ;;  %v673_v51 = vperm.slane %v1513_v52, 2 }
  0xbd   : > { %v381_v55 = vmul.f32 %v379_v49, %v372_v53  ;;  %837 = vmatpush.bf16.msrb.mxu3 %v1186_v38  ;;  %v674_v53 = vperm.slane %v1513_v52, 6 }
  0xbe   : > { %v382_v56 = vadd.f32 1e-08, %v380_v54 }
  0xbf   : > { %v383_v57 = vadd.f32 1e-08, %v381_v55 }
  0xc0   : > { %1208 = vrsqrt.f32 %v382_v56  ;;  %vm391_vm6 = vcmp.eq.f32.partialorder %v382_v56, inf  ;;  %v394_v7 = vand.u32 2147483648, %v382_v56  ;;  %vm393_vm7 = vcmp.eq.f32.partialorder %v382_v56, 0.0 }
  0xc1   : > { %1210 = vrsqrt.f32 %v383_v57  ;;  %vm403_vm8 = vcmp.eq.f32.partialorder %v383_v57, inf  ;;  %v406_v10 = vand.u32 2147483648, %v383_v57  ;;  %vm405_vm9 = vcmp.eq.f32.partialorder %v383_v57, 0.0  ;;  %838 = vmatpush.bf16.msrb.mxu3 %v1185_v40 }
  0xc2   : > { %1212 = vrcp.f32 %v1224_v33 }
  0xc6   : > { %v1209_v58 = vpop.eup %1208 }
  0xc7   : > { %v1211_v59 = vpop.eup %1210  ;;  %v385_v60 = vmul.f32 %v1209_v58, %v382_v56 }
  0xc8   : > { %v397_v61 = vmul.f32 %v1211_v59, %v383_v57  ;;  %v1213_v36 = vpop.eup %1212 }
  0xc9   : > { %v386_v62 = vmul.f32 %v1209_v58, %v385_v60  ;;  %v412_v41 = vmul.f32 256.0, %v1213_v36  ;;  %vm416_vm10 = vweird.f32 %v1213_v36 }
  0xca   : > { %v398_v63 = vmul.f32 %v1211_v59, %v397_v61 }
  0xcb   : > { %v387_v0 = vmul.f32 0.5, %v386_v62  ;;  %v413_v42 = vsub.f32 1.0, %v412_v41 }
  0xcc   : > { %v399_v1 = vmul.f32 0.5, %v398_v63 }
  0xcd   : > { %v388_v2 = vsub.f32 1.5, %v387_v0  ;;  %v414_v43 = vmul.f32 %v1213_v36, %v413_v42 }
  0xce   : > { %v400_v3 = vsub.f32 1.5, %v399_v1 }
  0xcf   : > { %v389_v4 = vmul.f32 %v1209_v58, %v388_v2  ;;  %v415_v44 = vadd.f32 %v1213_v36, %v414_v43  ;;  %v677_v58 = vperm.slane %v673_v51, 2 }
  0xd0   : > { %v401_v5 = vmul.f32 %v1211_v59, %v400_v3  ;;  %v678_v59 = vperm.slane %v674_v53, 2 }
  0xd1   : > { %v390_v6 = vmul.f32 %v389_v4, %v382_v56  ;;  %v417_v45 = vsel %vm416_vm10, %v1213_v36, %v415_v44 }
  0xd2   : > { %v402_v8 = vmul.f32 %v401_v5, %v383_v57 }
  0xd3   : > { %v392_v9 = vsel %vm391_vm6, %v382_v56, %v390_v6 }
  0xd4   : > { %v395_v11 = vsel %vm393_vm7, %v394_v7, %v392_v9  ;;  %v404_v12 = vsel %vm403_vm8, %v383_v57, %v402_v8 }
  0xd5   : > { %v407_v13 = vsel %vm405_vm9, %v406_v10, %v404_v12 }
  0xd6   : > { %v408_v14 = vadd.f32 %v407_v13, %v395_v11 }
  0xd8   : > { %409 = vadd.xlane.f32.xlu0 %v408_v14 }
 0x11b   : > { %v656_v21 = vpop.f32.mrf.mxu0 }
 0x11c   : > { %v669_v22 = vpop.f32.mrf.mxu1 }
 0x121   : > { %v630_v23 = vpop.f32.mrf.mxu2 }
 0x122   : > { %v643_v24 = vpop.f32.mrf.mxu3 }
 0x123   : > { %v658_v25 = vpop.f32.mrf.mxu0 }
 0x124   : > { %v671_v26 = vpop.f32.mrf.mxu1 }
 0x129   : > { %v632_v27 = vpop.f32.mrf.mxu2 }
 0x12a   : > { %v645_v28 = vpop.f32.mrf.mxu3 }
 0x14b   : > { %v410_v46 = vpop.xlane.xlu0 %409 }
 0x14c   : > { %v418_v47 = vmul.f32 %v417_v45, %v410_v46 }
 0x14e   : > { %v419_v48 = vmul.f32 %v418_v47, %v1513_v52  ;;  %v250_v52 = vld [vmem:[%s1589_s5] sm:$0x7] }
 0x14f   : > { %v721_v6 = vperm.slane %v250_v52, 0  ;;  %v847_v11 = vperm.slane %v250_v52, 1  ;;  %v856_v20 = vperm.slane %v250_v52, 2 }
 0x150   : > { %v455_v49 = vperm.slane %v419_v48, 1  ;;  %v456_v50 = vperm.slane %v419_v48, 5 }
 0x152   : > { %v459_v54 = vperm.slane %v455_v49, 1  ;;  %v460_v55 = vperm.slane %v456_v50, 1 }
 0x154   : > { %v631_v56 = vadd.f32 %v630_v23, %v459_v54  ;;  %v657_v57 = vadd.f32 %v656_v21, %v460_v55 }
 0x156   : > { %v644_v60 = vadd.f32 %v643_v24, %v631_v56  ;;  %v670_v61 = vadd.f32 %v669_v22, %v657_v57 }
 0x158   : > { %v679_v62 = vadd.f32 %v677_v58, %v644_v60  ;;  %v680_v63 = vadd.f32 %v678_v59, %v670_v61 }
 0x15a   : > { %vm681_vm11 = vcmp.ge.f32.partialorder %v679_v62, 0.0  ;;  %v683_v0 = vmul.f32 0.2, %v679_v62  ;;  %vm682_vm12 = vcmp.ge.f32.partialorder %v680_v63, 0.0  ;;  %v684_v1 = vmul.f32 0.2, %v680_v63 }
 0x15c   : > { %v685_v2 = vsel %vm681_vm11, %v679_v62, %v683_v0  ;;  %v686_v3 = vsel %vm682_vm12, %v680_v63, %v684_v1 }
 0x15d   : > { %v687_v4 = vpack.c.bf16 %v685_v2, %v685_v2  ;;  %v688_v5 = vpack.c.bf16 %v686_v3, %v686_v3 }
 0x15f   : > { %826 = vmatmul.bf16.vlgmr.msrb.gmra.mxu2 %v687_v4  ;;  %839 = vmatmul.bf16.vlgmr.msrb.gmra.mxu3 %v688_v5 }
 0x1e2   : > { %v827_v7 = vpop.f32.mrf.mxu2  ;;  %v840_v8 = vpop.f32.mrf.mxu3 }
 0x1e3   : > { %v828_v9 = vadd.f32 %v827_v7, %v721_v6 }
 0x1e5   : > { %v841_v10 = vadd.f32 %v840_v8, %v828_v9 }
 0x1e7   : > { %vm844_vm13 = vcmp.ge.f32.partialorder %v841_v10, 0.0  ;;  %v845_v12 = vmul.f32 0.2, %v841_v10 }
 0x1e9   : > { %v846_v13 = vsel %vm844_vm13, %v841_v10, %v845_v12 }
 0x1ea   : > { %v829_v14 = vpop.f32.mrf.mxu2  ;;  %v842_v15 = vpop.f32.mrf.mxu3  ;;  %v848_v16 = vmul.f32 %v847_v11, %v846_v13 }
 0x1ec   : > { %v849_v17 = vsel %vm331_vm2, %v848_v16, 0.0 }
 0x1ed   : > { %850 = vadd.xlane.f32.xlu0 %v849_v17 }
 0x260   : > { %v851_v21 = vpop.xlane.xlu0 %850 }
 0x261   : > { %v855_v22 = vsel %vm854_vm14, %v851_v21, %v846_v13 }
 0x262   : > { %v857_v23 = vadd.f32 %v856_v20, %v855_v22 }
 0x264   : > { %858 = vst [vmem:[%s246_s26] sm:$0xf] %v857_v23 }
 0x265 PF: > { %s16_s21 = sadd.s32 1, %s1220_s21  }
 0x266   : > { %p13_p4 = scmp.ge.s32.totalorder %s16_s21, 6  }
 0x268   :  { %15 = sbr.rel (!%p13_p4) target bundleno = 1 (0x1), region = 74 }

</bundles_post_ra>
